<compile_context>
chip_gen: v6e
topology: v6e:2x2x1
jax: 0.10.0
libtpu: 0.0.40
codegen_flags: <defaults>
</compile_context>

<pallas_src>
import functools
import math

import jax
import jax.numpy as jnp
from jax.experimental import pallas as pl
from jax.experimental.pallas import tpu as pltpu

_VMEM_LIMIT = 48 * 1024 * 1024  # safe on v5e/v6e (128 MiB phys) and v7x (64 MiB)


# ---------------------------------------------------------------------------
# Full-width linear kernel:  y = x @ w + b   (w passed pre-transposed)
# ---------------------------------------------------------------------------
def _linear_kernel(x_ref, w_ref, b_ref, o_ref):
    acc = jnp.dot(x_ref[0], w_ref[...], preferred_element_type=jnp.float32)
    o_ref[0] = (acc + b_ref[...]).astype(o_ref.dtype)


def _linear(x, w, b, *, compute_dtype, out_dtype, seq_block=256):
    """x: (B, S, Din); w: (Dout, Din) in PyTorch layout; b: (Dout,)."""
    B, S, Din = x.shape
    Dout = w.shape[0]
    ts = min(S, seq_block)
    assert S % ts == 0, "sequence length must tile evenly"

    x_c = x.astype(compute_dtype)
    w_t = w.T.astype(compute_dtype)                       # (Din, Dout)
    b_2 = b.reshape(1, Dout).astype(jnp.float32)          # lane-dense bias

    return pl.pallas_call(
        _linear_kernel,
        out_shape=jax.ShapeDtypeStruct((B, S, Dout), out_dtype),
        grid_spec=pltpu.PrefetchScalarGridSpec(
            num_scalar_prefetch=0,
            grid=(B, S // ts),
            in_specs=[
                pl.BlockSpec((1, ts, Din), lambda bi, si: (bi, si, 0)),
                pl.BlockSpec((Din, Dout), lambda bi, si: (0, 0)),
                pl.BlockSpec((1, Dout), lambda bi, si: (0, 0)),
            ],
            out_specs=pl.BlockSpec((1, ts, Dout), lambda bi, si: (bi, si, 0)),
        ),
        compiler_params=pltpu.CompilerParams(
            dimension_semantics=("parallel", "parallel"),
            vmem_limit_bytes=_VMEM_LIMIT),
    )(x_c, w_t, b_2)


# ---------------------------------------------------------------------------
# Flash attention on pre-projected per-head tensors (B, H, S, d_k)
# ---------------------------------------------------------------------------
def _flash_kernel(q_ref, k_ref, v_ref, mask_ref, o_ref,
                  m_scr, l_scr, acc_scr, *, scale, compute_dtype, approx_recip):
    j = pl.program_id(3)                       # kv-block (reduction) axis

    @pl.when(j == 0)
    def _():
        m_scr[...] = jnp.full_like(m_scr, -jnp.inf)
        l_scr[...] = jnp.zeros_like(l_scr)
        acc_scr[...] = jnp.zeros_like(acc_scr)

    # (hb, tq, d_k) x (hb, tk, d_k) -> (hb, tq, tk), f32 accumulation on MXU.
    s = jnp.einsum("hqd,hkd->hqk", q_ref[0], k_ref[0],
                   preferred_element_type=jnp.float32)
    s = jnp.floor(s * scale)                   # PyTorch `//` quirk, in f32
    s = jnp.where(mask_ref[0][None] == 0, jnp.float32(-1e9), s)

    # Online softmax update (running max / denominator / context numerator).
    m_prev = m_scr[...]
    m_new = jnp.maximum(m_prev, s.max(axis=-1, keepdims=True))
    alpha = jnp.exp(m_prev - m_new)
    p = jnp.exp(s - m_new)
    l_scr[...] = alpha * l_scr[...] + p.sum(axis=-1, keepdims=True)
    acc_scr[...] = alpha * acc_scr[...] + jnp.einsum(
        "hqk,hkd->hqd", p.astype(compute_dtype), v_ref[0],
        preferred_element_type=jnp.float32)
    m_scr[...] = m_new

    # dropout(attention_probs) is identity in eval mode.
    @pl.when(j == pl.num_programs(3) - 1)
    def _():
        inv_l = pl.reciprocal(l_scr[...], approx=approx_recip)
        o_ref[0] = (acc_scr[...] * inv_l).astype(o_ref.dtype)


def _flash_attention(qh, kh, vh, mask_i8, *, head_block, q_block, kv_block,
                     compute_dtype):
    B, H, Sq, d_k = qh.shape
    Sk = kh.shape[2]
    hb = head_block
    tq = min(Sq, q_block)
    tk = min(Sk, kv_block)
    assert H % hb == 0 and Sq % tq == 0 and Sk % tk == 0

    f32 = jnp.float32
    kernel = functools.partial(
        _flash_kernel, scale=1.0 / math.sqrt(d_k), compute_dtype=compute_dtype,
        approx_recip=(compute_dtype != jnp.float32))

    q_spec = pl.BlockSpec((1, hb, tq, d_k), lambda b, hg, qi, j: (b, hg, qi, 0))
    kv_spec = pl.BlockSpec((1, hb, tk, d_k), lambda b, hg, qi, j: (b, hg, j, 0))
    mask_spec = pl.BlockSpec((1, tq, tk), lambda b, hg, qi, j: (b, qi, j))
    out_spec = pl.BlockSpec((1, hb, tq, d_k), lambda b, hg, qi, j: (b, hg, qi, 0))

    return pl.pallas_call(
        kernel,
        out_shape=jax.ShapeDtypeStruct((B, H, Sq, d_k), compute_dtype),
        grid_spec=pltpu.PrefetchScalarGridSpec(
            num_scalar_prefetch=0,
            grid=(B, H // hb, Sq // tq, Sk // tk),
            in_specs=[q_spec, kv_spec, kv_spec, mask_spec],
            out_specs=out_spec,
            scratch_shapes=[
                pltpu.VMEM((hb, tq, 1), f32),     # running max
                pltpu.VMEM((hb, tq, 1), f32),     # running denominator
                pltpu.VMEM((hb, tq, d_k), f32),   # running context numerator
            ]),
        compiler_params=pltpu.CompilerParams(
            dimension_semantics=("parallel", "parallel", "parallel", "arbitrary"),
            vmem_limit_bytes=_VMEM_LIMIT),
    )(qh, kh, vh, mask_i8)


# ---------------------------------------------------------------------------
# Full MultiHeadAttentionBlock forward
# ---------------------------------------------------------------------------
def multi_head_attention(q, k, v, mask, params, *, n_heads,
                         compute_dtype=jnp.bfloat16,
                         q_block=256, kv_block=512, head_block=None,
                         out_dtype=None):
    """q, k, v: (B, S, d_model); mask: (B, 1, Sq, Sk), 0 = masked out."""
    B, Sq, D = q.shape
    Sk = k.shape[1]
    assert D % n_heads == 0, "d_model is not divisible by h"
    d_k = D // n_heads
    out_dtype = q.dtype if out_dtype is None else out_dtype
    cd = compute_dtype

    if head_block is None:
        head_block = max(1, min(n_heads, 256 // d_k))   # fill 256-wide MXU
    while n_heads % head_block:
        head_block -= 1

    # int8 mask: 4x less HBM traffic than a dense f32 mask.
    mask_i8 = (mask.reshape(B, Sq, Sk) != 0).astype(jnp.int8)

    wq, bq, wk, bk, wv, bv, wo, bo = params

    # Hoisted full-width projections (one pass over the inputs, N = d_model).
    qp = _linear(q, wq, bq, compute_dtype=cd, out_dtype=cd, seq_block=q_block)
    kp = _linear(k, wk, bk, compute_dtype=cd, out_dtype=cd, seq_block=kv_block)
    vp = _linear(v, wv, bv, compute_dtype=cd, out_dtype=cd, seq_block=kv_block)

    # Head split (pure layout, XLA): (B, S, D) -> (B, H, S, d_k) so the
    # attention kernel streams each head's K/V exactly once.
    def split_heads(x, S):
        return x.reshape(B, S, n_heads, d_k).transpose(0, 2, 1, 3)

    ctx = _flash_attention(split_heads(qp, Sq), split_heads(kp, Sk),
                           split_heads(vp, Sk), mask_i8,
                           head_block=head_block, q_block=q_block,
                           kv_block=kv_block, compute_dtype=cd)

    # Merge heads and apply w_o with a full-width (K = d_model) GEMM whose
    # output rows are lane-dense.
    merged = ctx.transpose(0, 2, 1, 3).reshape(B, Sq, D)
    return _linear(merged, wo, bo, compute_dtype=cd, out_dtype=out_dtype,
                   seq_block=q_block)


# ---------------------------------------------------------------------------
# Pure-JAX reference (mirrors the intended PyTorch forward)
# ---------------------------------------------------------------------------
def _reference(q, k, v, mask, params, *, n_heads, compute_dtype=jnp.float32):
    """compute_dtype=f32 -> faithful f32 reference; bf16 mirrors the kernel's
    cast points so the floor-division quirk sees identically rounded scores."""
    B, Sq, D = q.shape
    d_k = D // n_heads
    cd = compute_dtype
    f32 = jnp.float32
    wq, bq, wk, bk, wv, bv, wo, bo = params

    def lin(x, w, b):
        return jnp.dot(x.astype(cd), w.T.astype(cd),
                       preferred_element_type=f32) + b.astype(f32)

    def split(x):  # (B,S,D) -> (B,h,S,d_k)
        return x.reshape(B, -1, n_heads, d_k).transpose(0, 2, 1, 3)

    Q = split(lin(q, wq, bq)).astype(cd)
    K = split(lin(k, wk, bk)).astype(cd)
    V = split(lin(v, wv, bv)).astype(cd)

    s = jnp.einsum("bhqd,bhkd->bhqk", Q, K, preferred_element_type=f32)
    s = jnp.floor(s * f32(1.0 / math.sqrt(d_k)))   # `//` quirk
    s = jnp.where(mask == 0, f32(-1e9), s)
    p = jax.nn.softmax(s, axis=-1)                 # dropout: identity in eval
    x = jnp.einsum("bhqk,bhkd->bhqd", p.astype(cd), V,
                   preferred_element_type=f32)
    x = x.transpose(0, 2, 1, 3).reshape(B, Sq, D)
    return jnp.dot(x.astype(cd), wo.T.astype(cd),
                   preferred_element_type=f32) + bo.astype(f32)


def _init_linear(key, d_model):
    # Deterministic nn.Linear-style init: U(-1/sqrt(in), 1/sqrt(in)).
    kw, kb = jax.random.split(key)
    bound = 1.0 / math.sqrt(d_model)
    w = jax.random.uniform(kw, (d_model, d_model), jnp.float32, -bound, bound)
    b = jax.random.uniform(kb, (d_model,), jnp.float32, -bound, bound)
    return w, b


def _make_case(key, B, S, D):
    keys = jax.random.split(key, 7)
    params = tuple(x for i in range(4) for x in _init_linear(keys[i], D))
    q = jax.random.normal(keys[4], (B, S, D), jnp.float32)
    k = jax.random.normal(keys[5], (B, S, D), jnp.float32)
    v = jax.random.normal(keys[6], (B, S, D), jnp.float32)
    mask = jnp.tril(jnp.ones((S, S), jnp.float32))[None, None].repeat(B, axis=0)
    return q, k, v, mask, params


if __name__ == "__main__":
    key_small, key_big = jax.random.split(jax.random.PRNGKey(0))

    # --- small, module-consistent shapes -------------------------------------
    B, S, D, H = 2, 8, 32, 4
    q, k, v, mask, params = _make_case(key_small, B, S, D)

    # 1) f32 path: semantics check against the faithful f32 reference.
    out_f32 = jax.block_until_ready(
        multi_head_attention(q, k, v, mask, params, n_heads=H,
                             compute_dtype=jnp.float32))
    ref_f32 = _reference(q, k, v, mask, params, n_heads=H,
                         compute_dtype=jnp.float32)
    assert out_f32.shape == (B, S, D)
    assert jnp.allclose(out_f32, ref_f32, rtol=2e-2, atol=2e-2), \
        "f32 kernel mismatch vs reference"

    # 2) default bf16 MXU path vs the cast-mirrored reference.
    out_bf16 = jax.block_until_ready(
        multi_head_attention(q, k, v, mask, params, n_heads=H))
    ref_bf16 = _reference(q, k, v, mask, params, n_heads=H,
                          compute_dtype=jnp.bfloat16)
    assert out_bf16.shape == (B, S, D)
    assert jnp.allclose(out_bf16, ref_bf16, rtol=2e-2, atol=2e-2), \
        "bf16 kernel mismatch vs reference"

    # --- tiled exercise: multiple q/kv blocks and head groups ----------------
    B2, S2, D2, H2 = 2, 256, 512, 8          # d_k=64 -> head_block=4, 2 groups
    q2, k2, v2, mask2, params2 = _make_case(key_big, B2, S2, D2)
    out2 = jax.block_until_ready(
        multi_head_attention(q2, k2, v2, mask2, params2, n_heads=H2,
                             compute_dtype=jnp.float32,
                             q_block=128, kv_block=128))
    ref2 = _reference(q2, k2, v2, mask2, params2, n_heads=H2,
                      compute_dtype=jnp.float32)
    assert out2.shape == (B2, S2, D2)
    err = jnp.abs(out2 - ref2)
    tol = 2e-2 * (jnp.abs(ref2) + 1.0)
    frac_bad = float(jnp.mean((err > tol).astype(jnp.float32)))
    # The `//` floor quirk is discontinuous: a score within ~1 ulp of an integer
    # may floor differently between two valid f32 matmul lowerings, flipping
    # isolated elements, so require >=99.9% element-wise agreement.
    assert frac_bad < 1e-3, f"tiled kernel mismatch fraction {frac_bad}"

    print("KERNEL_OK")
</pallas_src>

<mosaic_0001>
module attributes {stable_mosaic.version = 11 : i64} {
  func.func @_linear_kernel(%arg0: i32, %arg1: i32, %arg2: memref<1x8x32xf32, #tpu.memory_space<vmem>>, %arg3: memref<32x32xf32, #tpu.memory_space<vmem>>, %arg4: memref<1x32xf32, #tpu.memory_space<vmem>>, %arg5: memref<1x8x32xf32, #tpu.memory_space<vmem>>) attributes {dimension_semantics = [#tpu.dimension_semantics<parallel>, #tpu.dimension_semantics<parallel>], iteration_bounds = array<i64: 2, 1>, scalar_prefetch = 0 : i64, scratch_operands = 0 : i64, tpu.core_type = #tpu.core_type<tc>, window_params = [{transform_indices = @transform_0, window_bounds = array<i64: 1, 8, 32>}, {pipeline_mode = #tpu.pipeline_mode<synchronous>, transform_indices = @transform_1, window_bounds = array<i64: 32, 32>}, {pipeline_mode = #tpu.pipeline_mode<synchronous>, transform_indices = @transform_2, window_bounds = array<i64: 1, 32>}, {transform_indices = @transform_3, window_bounds = array<i64: 1, 8, 32>}]} {
    %c0 = arith.constant 0 : index
    %c0_0 = arith.constant 0 : index
    %c0_1 = arith.constant 0 : index
    %0 = vector.load %arg2[%c0, %c0_0, %c0_1] : memref<1x8x32xf32, #tpu.memory_space<vmem>>, vector<1x8x32xf32>
    %1 = vector.shape_cast %0 : vector<1x8x32xf32> to vector<8x32xf32>
    %c0_2 = arith.constant 0 : index
    %c0_3 = arith.constant 0 : index
    %2 = vector.load %arg3[%c0_2, %c0_3] : memref<32x32xf32, #tpu.memory_space<vmem>>, vector<32x32xf32>
    %cst = arith.constant dense<0.000000e+00> : vector<8x32xf32>
    %3 = tpu.matmul %1, %2, %cst {dimension_numbers = #tpu.dot_dimension_numbers<[1], [0], [0], [1], [0, 0, 1, 1], [], []>} : vector<8x32xf32>, vector<32x32xf32>, vector<8x32xf32> -> vector<8x32xf32>
    %c0_4 = arith.constant 0 : index
    %c0_5 = arith.constant 0 : index
    %4 = vector.load %arg4[%c0_4, %c0_5] : memref<1x32xf32, #tpu.memory_space<vmem>>, vector<1x32xf32>
    %5 = vector.broadcast %4 : vector<1x32xf32> to vector<8x32xf32>
    %6 = arith.addf %3, %5 : vector<8x32xf32>
    %c0_6 = arith.constant 0 : index
    %c0_7 = arith.constant 0 : index
    %c0_8 = arith.constant 0 : index
    %7 = vector.load %arg5[%c0_6, %c0_7, %c0_8] : memref<1x8x32xf32, #tpu.memory_space<vmem>>, vector<1x8x32xf32>
    %8 = vector.shape_cast %7 : vector<1x8x32xf32> to vector<8x32xf32>
    %9 = vector.shape_cast %6 : vector<8x32xf32> to vector<1x8x32xf32>
    tpu.vector_store %arg5[%c0_6, %c0_7, %c0_8], %9 {strides = array<i32>} : memref<1x8x32xf32, #tpu.memory_space<vmem>>, vector<1x8x32xf32>,
    return
  }
  func.func @transform_0(%arg0: i32, %arg1: i32) -> (i32, i32, i32) {
    %c0_i32 = arith.constant 0 : i32
    %c0_i32_0 = arith.constant 0 : i32
    return %arg0, %arg1, %c0_i32 : i32, i32, i32
  }
  func.func @transform_1(%arg0: i32, %arg1: i32) -> (i32, i32) {
    %c0_i32 = arith.constant 0 : i32
    %c0_i32_0 = arith.constant 0 : i32
    %c0_i32_1 = arith.constant 0 : i32
    return %c0_i32, %c0_i32_0 : i32, i32
  }
  func.func @transform_2(%arg0: i32, %arg1: i32) -> (i32, i32) {
    %c0_i32 = arith.constant 0 : i32
    %c0_i32_0 = arith.constant 0 : i32
    %c0_i32_1 = arith.constant 0 : i32
    return %c0_i32, %c0_i32_0 : i32, i32
  }
  func.func @transform_3(%arg0: i32, %arg1: i32) -> (i32, i32, i32) {
    %c0_i32 = arith.constant 0 : i32
    %c0_i32_0 = arith.constant 0 : i32
    return %arg0, %arg1, %c0_i32 : i32, i32, i32
  }
}

</mosaic_0001>

<bundles_post_ra>
// kernel: tpu_custom_call.1
= control target key start
LH: loop header
LB: loop body
LE: loop exit
PB: predicated region body
PF: predicated region fallthrough
CT: control target
= control target key end

     0   :  { %8 = vsyncpa [#allocation3], 0  ;;  %s863_s0 = inlined_call_operand.hbm [shape: f32[2,8,32], index: 0, kind: input, shape index: {}]   ;;  %s864_s1 = inlined_call_operand.hbm [shape: f32[32,32], index: 1, kind: input, shape index: {}]   ;;  %s865_s2 = inlined_call_operand.vmem [shape: f32[1,32], index: 2, kind: input, shape index: {}]   ;;  %s866_s3 = inlined_call_operand.hbm [shape: f32[2,8,32], index: 3, kind: output, shape index: {}]  }
   0x1   :  { %10 = vsyncpa [#allocation3 + $0x1], 0 }
   0x2   :  { %11 = vsyncpa [#allocation6], 0 }
   0x3   :  { %12 = vsyncpa [#allocation4], 0 }
   0x4   :  { %14 = vsyncpa [#allocation4 + $0x1], 0  ;;  %s687_s12 = smov 0   ;;  %s689_s13 = smov 0  }
   0x5   :  { %s691_s14 = smov 0   ;;  %s693_s15 = smov 0  }
   0x6   :  { %s695_s16 = smov 0   ;;  %s697_s17 = smov 0  }
   0x7 LB: > { %s410_s18 = sadd.s32 4294967295, %s658_s17   ;;  %s411_s19 = sadd.s32 4294967294, %s658_s17   ;;  %s658_s17 = sphi %s697_s17, %s20_s17   ;;  %s654_s16 = sphi %s695_s16, %s884_s16   ;;  %s650_s15 = sphi %s693_s15, %s883_s15   ;;  %s646_s14 = sphi %s691_s14, %s882_s14   ;;  %s642_s13 = sphi %s689_s13, %s881_s13   ;;  %s638_s12 = sphi %s687_s12, %s880_s12  }
   0x8   : > { %p54_p0 = scmp.ne.s32.totalorder %s642_s13, %s638_s12  ;;  %p721_p1 = scmp.eq.s32.totalorder %s410_s18, 0 }
   0x9   : > { %p725_p2 = scmp.eq.s32.totalorder %s410_s18, 1  ;;  %p128_p3 = scmp.eq.s32.totalorder %s411_s19, 1 }
   0xa   : > { %p731_p4 = por %p721_p1, %p54_p0  ;;  %p412_p5 = scmp.ge.s32.totalorder %s658_s17, 1 }
   0xb   : > { %p736_p6 = por %p128_p3, %p54_p0  ;;  %p135_p7 = scmp.lt.s32.totalorder %s658_s17, 3 }
   0xc   : > { %s870_s22 = scalar_select %p731_p4, 1, 0 }
   0xd   : > { %s871_s23 = scalar_select %p736_p6, 1, 0 }
   0xe   : > { %p741_p8 = pnand %p412_p5, %p135_p7  ;;  %s660_s25 = smov [#allocation5]  }
   0xf   : > { %s147_s26 = sshll.u32 %s660_s25, 4  ;;  %s32_s28 = sadd.s32 1, %s654_s16  ;;  %s148_s26 = int_to_ptr.vmem [resolvable:$true] %s147_s26 }
  0x10   : > { %p451_p9 = pneg %p741_p8  ;;  %s531_s29 = scalar_lea.vmem %s148_s26, 512 }
  0x11   : > { %p532_p13 = scmp.ne.s32.totalorder %s148_s26, %s531_s29  ;;  %p539_p5 = scmp.lt.s32.totalorder %s148_s26, %s148_s26 }
  0x12   : > { %p750_p11 = pnand %p451_p9, %p721_p1  ;;  %p540_p7 = scmp.lt.s32.totalorder %s531_s29, %s531_s29 }
  0x14   : > { %p522_p12 = pneg %p750_p11  ;;  %p541_p6 = por %p540_p7, %p539_p5 }
  0x16   : > { %p534_p0 = pnand %p532_p13, %p522_p12 }
  0x18   : > { %p535_p3 = pneg %p534_p0 }
  0x1a   : > { %p542_p4 = pnand %p541_p6, %p535_p3 }
  0x1c   : > { %545 = shalt.err (!%p542_p4)
}
  0x1d   : > { %s661_s30 = smov 128   ;;  %s662_s4 = smov 8  }
  0x1e   : > { %454 = dma.hbm_to_vmem [thread:$0]  (!%p750_p11), %s864_s1, 512, %s148_s26, [#allocation6], %s661_s30, %s661_s30, %s662_s4  }
  0x1f   : > { %p34_p6 = scmp.ge.s32.totalorder %s32_s28, 2  ;;  %s41_s7 = sadd.s32 1, %s646_s14 }
  0x20   : > { %p48_p4 = scmp.ne.s32.totalorder %s646_s14, %s642_s13  ;;  %p49_p9 = scmp.eq.s32.totalorder %s658_s17, 0 }
  0x21   : > { %s886_s28 = smov (%p34_p6, %s32_s28), 0  ;;  %p464_p0 = scmp.lt.s32.totalorder %s658_s17, 2 }
  0x22   : > { %p768_p12 = por %p49_p9, %p48_p4  ;;  %p774_p13 = por %p725_p2, %p48_p4 }
  0x23   : > { %s36_s10 = ssub.s32 %s654_s16, %s886_s28  ;;  %s164_s11 = sand.u32 1, %s646_s14  }
  0x24   : > { %p39_p11 = scmp.eq.s32.totalorder %s36_s10, 0  ;;  %s415_s18 = sshll.u32 %s164_s11, 3 }
  0x25   : > { %s416_s25 = sshll.u32 %s654_s16, 7  ;;  %s168_s30 = scalar_lea.vmem [#allocation2], %s415_s18 }
  0x26   : > { %s783_s19 = scalar_select %p39_p11, %s646_s14, %s41_s7  }
  0x27   : > { %s174_s29 = scalar_lea.hbm %s863_s0, %s416_s25  ;;  %s176_s4 = sshll.u32 %s168_s30, 4  ;;  %s177_s4 = int_to_ptr.vmem [resolvable:$true] %s176_s4 }
  0x28   : > { %p791_p2 = pnand %p464_p0, %p768_p12  ;;  %s165_s5 = scalar_lea.sflag [#allocation3], %s164_s11 }
  0x29   : > { %s559_s6 = scalar_lea.vmem %s177_s4, 128  ;;  %s663_s7 = smov [#allocation2]  }
  0x2a   : > { %p548_p3 = pneg %p791_p2  ;;  %p560_p5 = scmp.ne.s32.totalorder %s177_s4, %s559_s6 }
  0x2b   : > { %s564_s10 = sshll.u32 %s663_s7, 4  ;;  %s565_s10 = int_to_ptr.vmem [resolvable:$false] %s564_s10 }
  0x2c   : > { %p562_p7 = pnand %p560_p5, %p548_p3  ;;  %s566_s25 = scalar_lea.vmem %s565_s10, 256 }
  0x2d   : > { %p567_p4 = scmp.lt.s32.totalorder %s177_s4, %s565_s10  ;;  %p568_p9 = scmp.lt.s32.totalorder %s566_s25, %s559_s6 }
  0x2e   : > { %p563_p6 = pneg %p562_p7 }
  0x2f   : > { %p569_p11 = por %p568_p9, %p567_p4 }
  0x31   : > { %p570_p10 = pnand %p569_p11, %p563_p6 }
  0x33   : > { %573 = shalt.err (!%p570_p10)
}
  0x34   : > { %458 = dma.hbm_to_vmem [thread:$0]  (!%p791_p2), %s174_s29, 128, %s177_s4, %s165_s5  }
  0x35   : > { %185 = sbr.rel (%p741_p8) target bundleno = 278 (0x116), region = 32  ;;  %s802_s8 = sand.u32 (!%p741_p8), 1, %s642_s13  }
  0x36   : > { %s418_s11 = sshll.u32 (!%p741_p8), %s802_s8, 3  ;;  %s188_s18 = scalar_lea.sflag (!%p741_p8), [#allocation3], %s802_s8 }
  0x37   : > { %s191_s26 = scalar_lea.vmem (!%p741_p8), [#allocation2], %s418_s11  ;;  %p877_p12 = scmp.ne.s32.totalorder (!%p741_p8), %s870_s22, 0 }
  0x3a   : > { %625 = dma.done.wait (%p877_p12), %s188_s18, 128  }
  0x3b   : > { %627 = vsyncadd (%p877_p12), %s188_s18, 4294967168 }
  0x3c   : > { %629 = dma.done.wait (%p721_p1), [#allocation6], 512  }
  0x3d   : > { %631 = vsyncadd (%p721_p1), [#allocation6], 4294966784  ;;  %v664_v0 = vmov 0.0   ;;  %vm665_vm0 = vmmov 0   ;;  %v222_v1 = vld [vmem:[#allocation5 + $0x18] sm:$0xff]  ;;  %v221_v2 = vld [vmem:[#allocation5 + $0x10] sm:$0xff] }
  0x3e   : > { %432 = vmatprep.subr.mxu0 %v664_v0  ;;  %440 = vmatprep.mubr.msk.f32.mxu0 %vm665_vm0, %v664_v0  ;;  %v220_v3 = vld [vmem:[#allocation5 + $0x8] sm:$0xff]  ;;  %v219_v4 = vld [vmem:[#allocation5] sm:$0xff]  ;;  %v218_v5 = vld [vmem:[%s191_s26] sm:$0xff]  ;;  %vm230_vm1 = vcmask 261120   ;;  %s424_s24 = sshll.u32 %s650_s15, 7  ;;  %s217_s27 = scalar_lea.vmem [#allocation7], %s418_s11 }
  0x3f   : > { %433 = vmatpush3.msra.mxu0 %v222_v1  ;;  %v421_v6 = vld [vmem:[%s865_s2] ss:$0 sm:$0xff]  ;;  %s320_s29 = sshll.u32 %s217_s27, 4  ;;  %s821_s21 = scalar_lea.hbm %s866_s3, %s424_s24  ;;  %s321_s29 = int_to_ptr.vmem [resolvable:$true] %s320_s29 }
  0x40   : > { %434 = vmatprep.subr.mxu0 %v664_v0  ;;  %s306_s5 = scalar_lea.sflag [#allocation4], %s802_s8  ;;  %s574_s6 = scalar_lea.vmem %s321_s29, 128 }
  0x41   : > { %435 = vmatpush3.msra.mxu0 %v221_v2  ;;  %p575_p1 = scmp.ne.s32.totalorder %s321_s29, %s574_s6  ;;  %s666_s7 = smov [#allocation7]  }
  0x42   : > { %436 = vmatprep.subr.mxu0 %v664_v0  ;;  %s578_s15 = sshll.u32 %s666_s7, 4  ;;  %s579_s15 = int_to_ptr.vmem [resolvable:$false] %s578_s15 }
  0x43   : > { %437 = vmatpush3.msra.mxu0 %v220_v3  ;;  %p576_p8 = pnand %p575_p1, %p774_p13  ;;  %s580_s10 = scalar_lea.vmem %s579_s15, 256 }
  0x44   : > { %438 = vmatprep.subr.mxu0 %v664_v0  ;;  %p581_p0 = scmp.lt.s32.totalorder %s321_s29, %s579_s15  ;;  %p582_p2 = scmp.lt.s32.totalorder %s580_s10, %s574_s6 }
  0x45   : > { %439 = vmatpush3.msra.mxu0 %v219_v4  ;;  %p577_p10 = pneg %p576_p8 }
  0x46   : > { %441 = vmatmul.mubr.msk.f32.vlgmr.msra.gmra.mxu0 %vm230_vm1, %v218_v5  ;;  %p583_p3 = por %p582_p2, %p581_p0 }
  0x48   : > { %p584_p5 = pnand %p583_p3, %p577_p10 }
 0x106   : > { %v300_v7 = vpop.f32.mrf.mxu0 }
 0x107   : > { %v301_v8 = vadd.f32 %v421_v6, %v300_v7 }
 0x108   : > { %v442_v9 = vpop.f32.mrf.mxu0 }
 0x109   : > { %304 = vst.msk [vmem:[%s217_s27] sm:$0xff] %vm230_vm1, %v301_v8 }
 0x10a   : > { %587 = shalt.err (!%p584_p5)
}
 0x10b   : > { %s588_s25 = scalar_lea.hbm %s821_s21, 128  ;;  %s592_s18 = scalar_lea.hbm %s866_s3, 256 }
 0x10c   : > { %p589_p7 = scmp.ne.s32.totalorder %s821_s21, %s588_s25  ;;  %p593_p9 = scmp.lt.s32.totalorder %s821_s21, %s866_s3 }
 0x10d   : > { %p594_p11 = scmp.lt.s32.totalorder %s592_s18, %s588_s25 }
 0x10e   : > { %p590_p6 = pnand %p589_p7, %p774_p13 }
 0x10f   : > { %p595_p12 = por %p594_p11, %p593_p9 }
 0x110   : > { %p591_p4 = pneg %p590_p6 }
 0x112   : > { %p596_p1 = pnand %p595_p12, %p591_p4 }
 0x114   : > { %599 = shalt.err (!%p596_p1)
}
 0x115   : > { %449 = dma.vmem_to_hbm [thread:$0]  (%p774_p13), %s321_s29, 128, %s821_s21, %s306_s5  }
 0x116 PF: > { %s332_s22 = sand.u32 1, %s638_s12   ;;  %p878_p8 = scmp.ne.s32.totalorder %s871_s23, 0 }
 0x117   : > { %p879_p10 = scmp.ge.s32.totalorder %s658_s17, 2  ;;  %s333_s24 = scalar_lea.sflag [#allocation4], %s332_s22 }
 0x119   : > { %p460_p0 = pnand %p879_p10, %p878_p8 }
 0x11b   : > { %p461_p2 = pneg %p460_p0 }
 0x11d   : > { %633 = dma.done.wait (%p461_p2), %s333_s24, 128  }
 0x11e   : > { %635 = vsyncadd (%p461_p2), %s333_s24, 4294967168  ;;  %s20_s17 = sadd.s32 1, %s658_s17   ;;  %s880_s12 = smov %s642_s13 }
 0x11f   : > { %p17_p3 = scmp.ge.s32.totalorder %s20_s17, 4   ;;  %s881_s13 = smov %s646_s14 }
 0x120   : > { %s882_s14 = smov %s783_s19  ;;  %s883_s15 = smov %s654_s16 }
 0x121   : > { %s884_s16 = smov %s886_s28  ;;  %19 = sbr.rel (!%p17_p3) target bundleno = 7 (0x7), region = 81 }
 0x126   :  { %338 = vsyncpa [#allocation3], 1 }
 0x127   :  { %340 = vsyncpa [#allocation3 + $0x1], 1 }
 0x128   :  { %341 = vsyncpa [#allocation6], 1 }
 0x129   :  { %342 = vsyncpa [#allocation4], 1 }
 0x12a   :  { %344 = vsyncpa [#allocation4 + $0x1], 1 }

</bundles_post_ra>
